<compile_context>
chip_gen: v5e
topology: v5e:2x2
jax: 0.10.0
libtpu: 0.0.40
codegen_flags: <defaults>
</compile_context>

<pallas_src>
import numpy as np
import jax
import jax.numpy as jnp
from jax.experimental import pallas as pl
from jax.experimental.pallas import tpu as pltpu


# ----------------------------- constants ------------------------------------
_Y_STD = np.array([[16, 11, 10, 16, 24, 40, 51, 61],
                   [12, 12, 14, 19, 26, 58, 60, 55],
                   [14, 13, 16, 24, 40, 57, 69, 56],
                   [14, 17, 22, 29, 51, 87, 80, 62],
                   [18, 22, 37, 56, 68, 109, 103, 77],
                   [24, 35, 55, 64, 81, 104, 113, 92],
                   [49, 64, 78, 87, 103, 121, 120, 101],
                   [72, 92, 95, 98, 112, 100, 103, 99]], dtype=np.float32)
_C_STD = np.full((8, 8), 99.0, dtype=np.float32)
_C_STD[:4, :4] = np.array([[17, 18, 24, 47],
                           [18, 21, 26, 66],
                           [24, 26, 56, 99],
                           [47, 66, 99, 99]], dtype=np.float32)
# The PyTorch reference stores the tables transposed (it works on (B, W, H) planes).
_Y_TABLE_REF = np.ascontiguousarray(_Y_STD.T)
_C_TABLE_REF = np.ascontiguousarray(_C_STD.T)

_XS = np.arange(8)
_COS = np.cos((2 * _XS[:, None] + 1) * _XS[None, :] * np.pi / 16)   # C[s, f]
_ALPHA = np.array([1.0 / np.sqrt(2)] + [1.0] * 7)


def _build_op64(table_ref):
    # rows:  rv flat index u*8+v   (u = frequency along the reference's W axis, v along H)
    # cols:  spatial flat index y*8+x (h-major within-patch, ready for h-major unpatchify)
    # OP[u*8+v, y*8+x] = table[u,v] * 0.25 * alpha[u]*alpha[v] * C[x,u]*C[y,v]
    op = 0.25 * np.einsum('uv,u,v,xu,yv->uvyx', table_ref, _ALPHA, _ALPHA, _COS, _COS)
    return op.reshape(64, 64).astype(np.float32)


_OP_Y64 = _build_op64(_Y_TABLE_REF)
_OP_C64 = _build_op64(_C_TABLE_REF)


# ----------------------------- Pallas kernel ---------------------------------
def _delta_kernel(eps_ref, rv_ref, op_ref, o_ref):
    # eps_ref: (tile, 1)   per-row 0.5*epsilon[batch]
    # rv_ref : (tile, W)   W = 64*pack flattened noise patches
    # op_ref : (W, W)      block-diagonal (quant-table * IDCT basis) operator
    lhs = rv_ref[...] * eps_ref[...]
    o_ref[...] = jnp.dot(lhs, op_ref[...], preferred_element_type=jnp.float32)


def _round_up(x, m):
    return (x + m - 1) // m * m


def _pick_tile(m, width):
    """Rows per grid step: ~2 MiB per stream per block, >=4 steps for large problems."""
    cap = max(8, (2 << 20) // (width * 4))
    if m <= 8:
        return m                                           # single full-extent block
    target = max(256, _round_up(-(-m // 4), 8))            # >=4 steps, blocks >= 256 rows
    return max(8, min(cap, target, _round_up(m, 8)))


def _jpeg_delta(rv, eps_half, op64_np, pack):
    """rv: (B, n, 8, 8) noise, eps_half: (B,) = 0.5*epsilon. Returns (B*n, 64) delta patches."""
    B, n = rv.shape[0], rv.shape[1]
    width = 64 * pack
    m = (B * n * 64) // width
    rows_per_img = (n * 64) // width                       # integral because pack | n
    rv_rows = rv.astype(jnp.float32).reshape(m, width)     # pure reshape, no copy
    eps_col = jnp.repeat(eps_half, rows_per_img).reshape(m, 1)
    op = jnp.asarray(np.kron(np.eye(pack, dtype=np.float32), op64_np))

    tile = _pick_tile(m, width)
    out = pl.pallas_call(
        _delta_kernel,
        out_shape=jax.ShapeDtypeStruct((m, width), jnp.float32),
        grid_spec=pltpu.PrefetchScalarGridSpec(
            num_scalar_prefetch=0,
            grid=(pl.cdiv(m, tile),),
            in_specs=[
                pl.BlockSpec((tile, 1), lambda i: (i, 0)),
                pl.BlockSpec((tile, width), lambda i: (i, 0)),
                pl.BlockSpec((width, width), lambda i: (0, 0)),
            ],
            out_specs=pl.BlockSpec((tile, width), lambda i: (i, 0)),
        ),
        compiler_params=pltpu.CompilerParams(dimension_semantics=("parallel",)),
    )(eps_col, rv_rows, op)
    return out.reshape(B * n, 64)


# ----------------------------- forward (kernel + XLA glue) -------------------
def jpeg_forward(pixel_inp, rounding_vars, epsilon, downsample_c=True, factor=1.0):
    B, C, H, W = pixel_inp.shape
    assert C == 3
    # TODO(synk): replicate-padding branch (H or W not a multiple of 16) not implemented.
    assert H % 16 == 0 and W % 16 == 0

    x = pixel_inp.astype(jnp.float32)
    r, g, b = x[:, 0], x[:, 1], x[:, 2]                    # (B, H, W) planes, no transpose

    y = 0.299 * r + 0.587 * g + 0.114 * b
    cb = -0.168736 * r - 0.331264 * g + 0.5 * b + 128.0
    cr = 0.5 * r - 0.418688 * g - 0.081312 * b + 128.0

    if downsample_c:
        hC, wC = H // 2, W // 2
        cb = cb.reshape(B, hC, 2, wC, 2).mean(axis=(2, 4))
        cr = cr.reshape(B, hC, 2, wC, 2).mean(axis=(2, 4))
    else:
        hC, wC = H, W

    eps_half = 0.5 * epsilon.astype(jnp.float32)
    op_y = _OP_Y64 * float(factor)
    op_c = _OP_C64 * float(factor)

    def delta_plane(rv, op64_np, h, w):
        nH, nW = h // 8, w // 8
        n = nH * nW
        pack = 4 if n % 4 == 0 else (2 if n % 2 == 0 else 1)
        flat = _jpeg_delta(rv, eps_half, op64_np, pack)    # (B*n, 64)
        # rows are in the reference's (b, wblock, hblock) patch order, cols are (y, x) h-major
        d = flat.reshape(B, nW, nH, 8, 8).transpose(0, 2, 3, 1, 4)
        return d.reshape(B, h, w)

    y2 = y + delta_plane(rounding_vars[0], op_y, H, W)
    cb2 = cb + delta_plane(rounding_vars[1], op_c, hC, wC)
    cr2 = cr + delta_plane(rounding_vars[2], op_c, hC, wC)

    if downsample_c:
        cb2 = jnp.broadcast_to(cb2[:, :, None, :, None], (B, hC, 2, wC, 2)).reshape(B, H, W)
        cr2 = jnp.broadcast_to(cr2[:, :, None, :, None], (B, hC, 2, wC, 2)).reshape(B, H, W)

    cbc = cb2 - 128.0
    crc = cr2 - 128.0
    r2 = y2 + 1.402 * crc
    g2 = y2 - 0.344136 * cbc - 0.714136 * crc
    b2 = y2 + 1.772 * cbc
    return jnp.clip(jnp.stack([r2, g2, b2], axis=1), 0.0, 255.0)


# ----------------------------- pure-jnp reference (literal port) -------------
def _jpeg_reference(pixel_inp, rounding_vars, epsilon, factor=1.0):
    B, _, H, W = pixel_inp.shape
    img = jnp.transpose(pixel_inp.astype(jnp.float32), (0, 3, 2, 1))   # (B, W, H, 3)
    m_fwd = jnp.asarray(np.array([[0.299, 0.587, 0.114],
                                  [-0.168736, -0.331264, 0.5],
                                  [0.5, -0.418688, -0.081312]], np.float32).T)
    ycc = jnp.tensordot(img, m_fwd, axes=1, precision='highest') + jnp.asarray([0.0, 128.0, 128.0])
    y, cb, cr = ycc[..., 0], ycc[..., 1], ycc[..., 2]
    cb = cb.reshape(B, W // 2, 2, H // 2, 2).mean(axis=(2, 4))
    cr = cr.reshape(B, W // 2, 2, H // 2, 2).mean(axis=(2, 4))

    dct_t = jnp.asarray(np.einsum('xu,yv->xyuv', _COS, _COS).astype(np.float32))
    idct_t = jnp.asarray(np.einsum('xu,yv->uvxy', _COS, _COS).astype(np.float32))
    scale = jnp.asarray((np.outer(_ALPHA, _ALPHA) * 0.25).astype(np.float32))
    alpha_o = jnp.asarray(np.outer(_ALPHA, _ALPHA).astype(np.float32))
    lam = epsilon.astype(jnp.float32)[:, None, None, None]

    def to_patches(plane, d1, d2):
        p = plane.reshape(B, d1 // 8, 8, d2 // 8, 8)
        return jnp.swapaxes(p, 2, 3).reshape(B, -1, 8, 8)

    def to_image(p, d1, d2):
        p = p.reshape(B, d1 // 8, d2 // 8, 8, 8)
        return jnp.swapaxes(p, 2, 3).reshape(B, d1, d2)

    def component(plane, rv, table_ref, d1, d2):
        p = to_patches(plane, d1, d2)
        coef = scale * jnp.einsum('bnxy,xyuv->bnuv', p - 128.0, dct_t, precision='highest')
        q = coef / (jnp.asarray(table_ref) * factor)
        q = q + lam * ((0.5 + 0.5 * rv.astype(jnp.float32)) - 0.5)
        dq = q * (jnp.asarray(table_ref) * factor)
        rec = 0.25 * jnp.einsum('bnuv,uvxy->bnxy', dq * alpha_o, idct_t,
                                precision='highest') + 128.0
        return to_image(rec, d1, d2)

    y = component(y, rounding_vars[0], _Y_TABLE_REF, W, H)
    cb = component(cb, rounding_vars[1], _C_TABLE_REF, W // 2, H // 2)
    cr = component(cr, rounding_vars[2], _C_TABLE_REF, W // 2, H // 2)

    def upsample(p):
        return jnp.broadcast_to(p[:, :, None, :, None],
                                (B, W // 2, 2, H // 2, 2)).reshape(B, W, H)

    img2 = jnp.stack([y, upsample(cb), upsample(cr)], axis=-1)
    m_inv = jnp.asarray(np.array([[1.0, 0.0, 1.402],
                                  [1.0, -0.344136, -0.714136],
                                  [1.0, 1.772, 0.0]], np.float32).T)
    rgb = jnp.tensordot(img2 + jnp.asarray([0.0, -128.0, -128.0]), m_inv,
                        axes=1, precision='highest')
    rgb = jnp.clip(rgb, 0.0, 255.0)
    return jnp.transpose(rgb, (0, 3, 2, 1))


# ----------------------------- main ------------------------------------------
if __name__ == "__main__":
    key = jax.random.PRNGKey(0)
    B, C, H, W = 2, 3, 16, 16
    k1, k2, k3, k4 = jax.random.split(key, 4)
    x = jax.random.uniform(k1, (B, C, H, W), dtype=jnp.float32) * 255.0
    n_y = (H // 8) * (W // 8)      # luma patches per image
    n_c = (H // 16) * (W // 16)    # chroma patches per image (after 4:2:0 downsample)
    rounding_vars = (
        jax.random.uniform(k2, (B, n_y, 8, 8), dtype=jnp.float32),
        jax.random.uniform(k3, (B, n_c, 8, 8), dtype=jnp.float32),
        jax.random.uniform(k4, (B, n_c, 8, 8), dtype=jnp.float32),
    )
    epsilon = jnp.full((B,), 4.0, dtype=jnp.float32)       # lambder

    out = jax.jit(jpeg_forward)(x, rounding_vars, epsilon)
    out = jax.block_until_ready(out)
    assert out.shape == (B, C, H, W)
    assert bool(jnp.all(jnp.isfinite(out)))

    ref = jax.block_until_ready(jax.jit(_jpeg_reference)(x, rounding_vars, epsilon))
    max_err = float(jnp.max(jnp.abs(out - ref)))
    assert max_err < 1e-1, f"mismatch vs pure-jnp reference: max abs err = {max_err}"

    print("KERNEL_OK")
</pallas_src>

<mosaic_0001>
module attributes {stable_mosaic.version = 11 : i64} {
  func.func @_delta_kernel(%arg0: i32, %arg1: memref<2x1xf32, #tpu.memory_space<vmem>>, %arg2: memref<2x256xf32, #tpu.memory_space<vmem>>, %arg3: memref<256x256xf32, #tpu.memory_space<vmem>>, %arg4: memref<2x256xf32, #tpu.memory_space<vmem>>) attributes {dimension_semantics = [#tpu.dimension_semantics<parallel>], iteration_bounds = array<i64: 1>, scalar_prefetch = 0 : i64, scratch_operands = 0 : i64, tpu.core_type = #tpu.core_type<tc>, window_params = [{transform_indices = @transform_0, window_bounds = array<i64: 2, 1>}, {transform_indices = @transform_1, window_bounds = array<i64: 2, 256>}, {pipeline_mode = #tpu.pipeline_mode<synchronous>, transform_indices = @transform_2, window_bounds = array<i64: 256, 256>}, {transform_indices = @transform_3, window_bounds = array<i64: 2, 256>}]} {
    %c0 = arith.constant 0 : index
    %c0_0 = arith.constant 0 : index
    %0 = vector.load %arg2[%c0, %c0_0] : memref<2x256xf32, #tpu.memory_space<vmem>>, vector<2x256xf32>
    %c0_1 = arith.constant 0 : index
    %c0_2 = arith.constant 0 : index
    %1 = vector.load %arg1[%c0_1, %c0_2] : memref<2x1xf32, #tpu.memory_space<vmem>>, vector<2x1xf32>
    %2 = vector.broadcast %1 : vector<2x1xf32> to vector<2x256xf32>
    %3 = arith.mulf %0, %2 : vector<2x256xf32>
    %c0_3 = arith.constant 0 : index
    %c0_4 = arith.constant 0 : index
    %4 = vector.load %arg3[%c0_3, %c0_4] : memref<256x256xf32, #tpu.memory_space<vmem>>, vector<256x256xf32>
    %cst = arith.constant dense<0.000000e+00> : vector<2x256xf32>
    %5 = tpu.matmul %3, %4, %cst {dimension_numbers = #tpu.dot_dimension_numbers<[1], [0], [0], [1], [0, 0, 1, 1], [], []>} : vector<2x256xf32>, vector<256x256xf32>, vector<2x256xf32> -> vector<2x256xf32>
    %c0_5 = arith.constant 0 : index
    %c0_6 = arith.constant 0 : index
    %6 = vector.load %arg4[%c0_5, %c0_6] : memref<2x256xf32, #tpu.memory_space<vmem>>, vector<2x256xf32>
    tpu.vector_store %arg4[%c0_5, %c0_6], %5 {strides = array<i32>} : memref<2x256xf32, #tpu.memory_space<vmem>>, vector<2x256xf32>,
    return
  }
  func.func @transform_0(%arg0: i32) -> (i32, i32) {
    %c0_i32 = arith.constant 0 : i32
    %c0_i32_0 = arith.constant 0 : i32
    return %arg0, %c0_i32 : i32, i32
  }
  func.func @transform_1(%arg0: i32) -> (i32, i32) {
    %c0_i32 = arith.constant 0 : i32
    %c0_i32_0 = arith.constant 0 : i32
    return %arg0, %c0_i32 : i32, i32
  }
  func.func @transform_2(%arg0: i32) -> (i32, i32) {
    %c0_i32 = arith.constant 0 : i32
    %c0_i32_0 = arith.constant 0 : i32
    %c0_i32_1 = arith.constant 0 : i32
    return %c0_i32, %c0_i32_0 : i32, i32
  }
  func.func @transform_3(%arg0: i32) -> (i32, i32) {
    %c0_i32 = arith.constant 0 : i32
    %c0_i32_0 = arith.constant 0 : i32
    return %arg0, %c0_i32 : i32, i32
  }
}

module attributes {stable_mosaic.version = 11 : i64} {
  func.func @_delta_kernel(%arg0: i32, %arg1: memref<2x1xf32, #tpu.memory_space<vmem>>, %arg2: memref<2x64xf32, #tpu.memory_space<vmem>>, %arg3: memref<64x64xf32, #tpu.memory_space<vmem>>, %arg4: memref<2x64xf32, #tpu.memory_space<vmem>>) attributes {dimension_semantics = [#tpu.dimension_semantics<parallel>], iteration_bounds = array<i64: 1>, scalar_prefetch = 0 : i64, scratch_operands = 0 : i64, tpu.core_type = #tpu.core_type<tc>, window_params = [{transform_indices = @transform_0, window_bounds = array<i64: 2, 1>}, {transform_indices = @transform_1, window_bounds = array<i64: 2, 64>}, {pipeline_mode = #tpu.pipeline_mode<synchronous>, transform_indices = @transform_2, window_bounds = array<i64: 64, 64>}, {transform_indices = @transform_3, window_bounds = array<i64: 2, 64>}]} {
    %c0 = arith.constant 0 : index
    %c0_0 = arith.constant 0 : index
    %0 = vector.load %arg2[%c0, %c0_0] : memref<2x64xf32, #tpu.memory_space<vmem>>, vector<2x64xf32>
    %c0_1 = arith.constant 0 : index
    %c0_2 = arith.constant 0 : index
    %1 = vector.load %arg1[%c0_1, %c0_2] : memref<2x1xf32, #tpu.memory_space<vmem>>, vector<2x1xf32>
    %2 = vector.broadcast %1 : vector<2x1xf32> to vector<2x64xf32>
    %3 = arith.mulf %0, %2 : vector<2x64xf32>
    %c0_3 = arith.constant 0 : index
    %c0_4 = arith.constant 0 : index
    %4 = vector.load %arg3[%c0_3, %c0_4] : memref<64x64xf32, #tpu.memory_space<vmem>>, vector<64x64xf32>
    %cst = arith.constant dense<0.000000e+00> : vector<2x64xf32>
    %5 = tpu.matmul %3, %4, %cst {dimension_numbers = #tpu.dot_dimension_numbers<[1], [0], [0], [1], [0, 0, 1, 1], [], []>} : vector<2x64xf32>, vector<64x64xf32>, vector<2x64xf32> -> vector<2x64xf32>
    %c0_5 = arith.constant 0 : index
    %c0_6 = arith.constant 0 : index
    %6 = vector.load %arg4[%c0_5, %c0_6] : memref<2x64xf32, #tpu.memory_space<vmem>>, vector<2x64xf32>
    tpu.vector_store %arg4[%c0_5, %c0_6], %5 {strides = array<i32>} : memref<2x64xf32, #tpu.memory_space<vmem>>, vector<2x64xf32>,
    return
  }
  func.func @transform_0(%arg0: i32) -> (i32, i32) {
    %c0_i32 = arith.constant 0 : i32
    %c0_i32_0 = arith.constant 0 : i32
    return %arg0, %c0_i32 : i32, i32
  }
  func.func @transform_1(%arg0: i32) -> (i32, i32) {
    %c0_i32 = arith.constant 0 : i32
    %c0_i32_0 = arith.constant 0 : i32
    return %arg0, %c0_i32 : i32, i32
  }
  func.func @transform_2(%arg0: i32) -> (i32, i32) {
    %c0_i32 = arith.constant 0 : i32
    %c0_i32_0 = arith.constant 0 : i32
    %c0_i32_1 = arith.constant 0 : i32
    return %c0_i32, %c0_i32_0 : i32, i32
  }
  func.func @transform_3(%arg0: i32) -> (i32, i32) {
    %c0_i32 = arith.constant 0 : i32
    %c0_i32_0 = arith.constant 0 : i32
    return %arg0, %c0_i32 : i32, i32
  }
}

</mosaic_0001>

<bundles_post_ra>
// kernel: jpeg_forward.3
= control target key start
LH: loop header
LB: loop body
LE: loop exit
PB: predicated region body
PF: predicated region fallthrough
CT: control target
= control target key end

     0   :  { %8 = vsyncpa [#allocation3], 0  ;;  %s236_s15 = smov [#allocation2]   ;;  %s237_s17 = smov 256   ;;  %s273_s0 = inlined_call_operand.vmem [shape: f32[2,1], index: 0, kind: input, shape index: {}]   ;;  %s274_s1 = inlined_call_operand.vmem [shape: f32[2,256], index: 1, kind: input, shape index: {}]   ;;  %s275_s2 = inlined_call_operand.hbm [shape: f32[256,256], index: 2, kind: input, shape index: {}]   ;;  %s276_s3 = inlined_call_operand.vmem [shape: f32[2,256], index: 3, kind: output, shape index: {}]  }
   0x1   :  { %s17_s14 = sshll.u32 %s275_s2, 4  ;;  %s19_s16 = sshll.u32 %s236_s15, 4  ;;  %s18_s14 = int_to_ptr.hbm [resolvable:$true] %s17_s14  ;;  %s20_s16 = int_to_ptr.vmem [resolvable:$true] %s19_s16 }
   0x2   :  { %s238_s18 = smov 16  }
   0x3   :  { %25 = dma.hbm_to_vmem [thread:$0]  %s18_s14, 8192, %s20_s16, [#allocation3], %s237_s17, %s237_s17, %s238_s18  }
   0x4   :  { %234 = dma.done.wait [#allocation3], 8192  }
   0x5   :  { %235 = vsyncadd [#allocation3], 4294959104  ;;  %v239_v0 = vmov 0   ;;  %v31_v1 = vld [vmem:[%s273_s0] sm:$0x3]  ;;  %v72_v2 = vld [vmem:[#allocation2 + $0xf0] sm:$0xff] }
   0x6   :  { %209 = vset.pattern.permute.xlu0 %v239_v0  ;;  %v104_v3 = vld [vmem:[#allocation2 + $0x1f0] sm:$0xff]  ;;  %112 = vmatpush.msra.mxu0 %v72_v2  ;;  %v73_v4 = vld [vmem:[#allocation2 + $0xf8] sm:$0xff]  ;;  %v70_v6 = vld [vmem:[#allocation2 + $0xe0] sm:$0xff]  ;;  %v240_v2 = vmov 269488144   ;;  %vm195_vm0 = vcmask 1041408  }
   0x7   :  { %34 = vperm.xlu0 %209, %v31_v1   ;;  %v105_v5 = vld [vmem:[#allocation2 + $0x1f8] sm:$0xff]  ;;  %132 = vmatpush.msra.mxu1 %v104_v3  ;;  %v102_v7 = vld [vmem:[#allocation2 + $0x1e0] sm:$0xff]  ;;  %v71_v8 = vld [vmem:[#allocation2 + $0xe8] sm:$0xff]  ;;  %v37_v3 = vunpack.c.l.s4 %v240_v2 }
   0x8   :  { %152 = vmatpush.msra.mxu2 %v73_v4  ;;  %v103_v9 = vld [vmem:[#allocation2 + $0x1e8] sm:$0xff]  ;;  %172 = vmatpush.msra.mxu3 %v105_v5  ;;  %v68_v10 = vld [vmem:[#allocation2 + $0xd0] sm:$0xff]  ;;  %v69_v12 = vld [vmem:[#allocation2 + $0xd8] sm:$0xff] }
   0x9   :  { %113 = vmatpush.msra.mxu0 %v70_v6  ;;  %v100_v11 = vld [vmem:[#allocation2 + $0x1d0] sm:$0xff]  ;;  %133 = vmatpush.msra.mxu1 %v102_v7  ;;  %v101_v13 = vld [vmem:[#allocation2 + $0x1d8] sm:$0xff]  ;;  %v66_v14 = vld [vmem:[#allocation2 + $0xc0] sm:$0xff]  ;;  %v38_v4 = vunpack.c.0.s8 %v37_v3 }
   0xa   :  { %153 = vmatpush.msra.mxu2 %v71_v8  ;;  %173 = vmatpush.msra.mxu3 %v103_v9  ;;  %v98_v15 = vld [vmem:[#allocation2 + $0x1c0] sm:$0xff]  ;;  %v67_v16 = vld [vmem:[#allocation2 + $0xc8] sm:$0xff]  ;;  %v64_v18 = vld [vmem:[#allocation2 + $0xb0] sm:$0xff] }
   0xb   :  { %114 = vmatpush.msra.mxu0 %v68_v10  ;;  %134 = vmatpush.msra.mxu1 %v100_v11  ;;  %v99_v17 = vld [vmem:[#allocation2 + $0x1c8] sm:$0xff]  ;;  %v96_v19 = vld [vmem:[#allocation2 + $0x1b0] sm:$0xff]  ;;  %v65_v20 = vld [vmem:[#allocation2 + $0xb8] sm:$0xff] }
   0xc   :  { %154 = vmatpush.msra.mxu2 %v69_v12  ;;  %174 = vmatpush.msra.mxu3 %v101_v13  ;;  %v97_v21 = vld [vmem:[#allocation2 + $0x1b8] sm:$0xff]  ;;  %v62_v22 = vld [vmem:[#allocation2 + $0xa0] sm:$0xff]  ;;  %v63_v24 = vld [vmem:[#allocation2 + $0xa8] sm:$0xff] }
   0xd   :  { %115 = vmatpush.msra.mxu0 %v66_v14  ;;  %135 = vmatpush.msra.mxu1 %v98_v15  ;;  %v94_v23 = vld [vmem:[#allocation2 + $0x1a0] sm:$0xff]  ;;  %v95_v25 = vld [vmem:[#allocation2 + $0x1a8] sm:$0xff]  ;;  %v60_v26 = vld [vmem:[#allocation2 + $0x90] sm:$0xff] }
   0xe   :  { %155 = vmatpush.msra.mxu2 %v67_v16  ;;  %175 = vmatpush.msra.mxu3 %v99_v17  ;;  %v92_v27 = vld [vmem:[#allocation2 + $0x190] sm:$0xff]  ;;  %v61_v28 = vld [vmem:[#allocation2 + $0x98] sm:$0xff]  ;;  %v58_v30 = vld [vmem:[#allocation2 + $0x80] sm:$0xff] }
   0xf   :  { %116 = vmatpush.msra.mxu0 %v64_v18  ;;  %136 = vmatpush.msra.mxu1 %v96_v19  ;;  %v93_v29 = vld [vmem:[#allocation2 + $0x198] sm:$0xff]  ;;  %v90_v31 = vld [vmem:[#allocation2 + $0x180] sm:$0xff]  ;;  %v59_v32 = vld [vmem:[#allocation2 + $0x88] sm:$0xff] }
  0x10   :  { %156 = vmatpush.msra.mxu2 %v65_v20  ;;  %176 = vmatpush.msra.mxu3 %v97_v21  ;;  %v91_v33 = vld [vmem:[#allocation2 + $0x188] sm:$0xff]  ;;  %v56_v34 = vld [vmem:[#allocation2 + $0x70] sm:$0xff]  ;;  %v57_v36 = vld [vmem:[#allocation2 + $0x78] sm:$0xff] }
  0x11   :  { %117 = vmatpush.msra.mxu0 %v62_v22  ;;  %137 = vmatpush.msra.mxu1 %v94_v23  ;;  %v88_v35 = vld [vmem:[#allocation2 + $0x170] sm:$0xff]  ;;  %v89_v37 = vld [vmem:[#allocation2 + $0x178] sm:$0xff]  ;;  %v54_v38 = vld [vmem:[#allocation2 + $0x60] sm:$0xff] }
  0x12   :  { %157 = vmatpush.msra.mxu2 %v63_v24  ;;  %177 = vmatpush.msra.mxu3 %v95_v25  ;;  %v86_v39 = vld [vmem:[#allocation2 + $0x160] sm:$0xff]  ;;  %v55_v40 = vld [vmem:[#allocation2 + $0x68] sm:$0xff]  ;;  %v52_v42 = vld [vmem:[#allocation2 + $0x50] sm:$0xff] }
  0x13   :  { %118 = vmatpush.msra.mxu0 %v60_v26  ;;  %138 = vmatpush.msra.mxu1 %v92_v27  ;;  %v87_v41 = vld [vmem:[#allocation2 + $0x168] sm:$0xff]  ;;  %v84_v43 = vld [vmem:[#allocation2 + $0x150] sm:$0xff]  ;;  %v53_v44 = vld [vmem:[#allocation2 + $0x58] sm:$0xff] }
  0x14   :  { %158 = vmatpush.msra.mxu2 %v61_v28  ;;  %178 = vmatpush.msra.mxu3 %v93_v29  ;;  %v85_v45 = vld [vmem:[#allocation2 + $0x158] sm:$0xff]  ;;  %v50_v46 = vld [vmem:[#allocation2 + $0x40] sm:$0xff]  ;;  %v51_v48 = vld [vmem:[#allocation2 + $0x48] sm:$0xff] }
  0x15   :  { %119 = vmatpush.msra.mxu0 %v58_v30  ;;  %139 = vmatpush.msra.mxu1 %v90_v31  ;;  %v82_v47 = vld [vmem:[#allocation2 + $0x140] sm:$0xff]  ;;  %v83_v49 = vld [vmem:[#allocation2 + $0x148] sm:$0xff]  ;;  %v48_v50 = vld [vmem:[#allocation2 + $0x30] sm:$0xff] }
  0x16   :  { %159 = vmatpush.msra.mxu2 %v59_v32  ;;  %179 = vmatpush.msra.mxu3 %v91_v33  ;;  %v80_v51 = vld [vmem:[#allocation2 + $0x130] sm:$0xff]  ;;  %v49_v52 = vld [vmem:[#allocation2 + $0x38] sm:$0xff]  ;;  %v46_v54 = vld [vmem:[#allocation2 + $0x20] sm:$0xff] }
  0x17   :  { %120 = vmatpush.msra.mxu0 %v56_v34  ;;  %140 = vmatpush.msra.mxu1 %v88_v35  ;;  %v81_v53 = vld [vmem:[#allocation2 + $0x138] sm:$0xff]  ;;  %v78_v55 = vld [vmem:[#allocation2 + $0x120] sm:$0xff]  ;;  %v47_v56 = vld [vmem:[#allocation2 + $0x28] sm:$0xff] }
  0x18   :  { %160 = vmatpush.msra.mxu2 %v57_v36  ;;  %180 = vmatpush.msra.mxu3 %v89_v37  ;;  %v79_v57 = vld [vmem:[#allocation2 + $0x128] sm:$0xff]  ;;  %v44_v58 = vld [vmem:[#allocation2 + $0x10] sm:$0xff]  ;;  %v45_v60 = vld [vmem:[#allocation2 + $0x18] sm:$0xff] }
  0x19   :  { %121 = vmatpush.msra.mxu0 %v54_v38  ;;  %141 = vmatpush.msra.mxu1 %v86_v39  ;;  %v76_v59 = vld [vmem:[#allocation2 + $0x110] sm:$0xff]  ;;  %v77_v61 = vld [vmem:[#allocation2 + $0x118] sm:$0xff]  ;;  %v42_v62 = vld [vmem:[#allocation2] sm:$0xff] }
  0x1a   :  { %161 = vmatpush.msra.mxu2 %v55_v40  ;;  %181 = vmatpush.msra.mxu3 %v87_v41  ;;  %v74_v63 = vld [vmem:[#allocation2 + $0x100] sm:$0xff]  ;;  %v43_v0 = vld [vmem:[#allocation2 + $0x8] sm:$0xff]  ;;  %v30_v6 = vld [vmem:[%s274_s1] sm:$0xf] }
  0x1b   :  { %122 = vmatpush.msra.mxu0 %v52_v42  ;;  %142 = vmatpush.msra.mxu1 %v84_v43  ;;  %v75_v1 = vld [vmem:[#allocation2 + $0x108] sm:$0xff] }
  0x1c   :  { %162 = vmatpush.msra.mxu2 %v53_v44  ;;  %182 = vmatpush.msra.mxu3 %v85_v45 }
  0x1d   :  { %123 = vmatpush.msra.mxu0 %v50_v46  ;;  %143 = vmatpush.msra.mxu1 %v82_v47 }
  0x1e   :  { %163 = vmatpush.msra.mxu2 %v51_v48  ;;  %183 = vmatpush.msra.mxu3 %v83_v49 }
  0x1f   :  { %124 = vmatpush.msra.mxu0 %v48_v50  ;;  %144 = vmatpush.msra.mxu1 %v80_v51 }
  0x20   :  { %164 = vmatpush.msra.mxu2 %v49_v52  ;;  %184 = vmatpush.msra.mxu3 %v81_v53 }
  0x21   :  { %125 = vmatpush.msra.mxu0 %v46_v54  ;;  %145 = vmatpush.msra.mxu1 %v78_v55 }
  0x22   :  { %165 = vmatpush.msra.mxu2 %v47_v56  ;;  %185 = vmatpush.msra.mxu3 %v79_v57 }
  0x23   :  { %126 = vmatpush.msra.mxu0 %v44_v58  ;;  %146 = vmatpush.msra.mxu1 %v76_v59 }
  0x24   :  { %166 = vmatpush.msra.mxu2 %v45_v60  ;;  %186 = vmatpush.msra.mxu3 %v77_v61 }
  0x25   :  { %127 = vmatpush.msra.mxu0 %v42_v62  ;;  %147 = vmatpush.msra.mxu1 %v74_v63 }
  0x26   :  { %167 = vmatpush.msra.mxu2 %v43_v0  ;;  %187 = vmatpush.msra.mxu3 %v75_v1 }
  0x79   :  { %v35_v5 = vpop.permute.xlu0 %34 }
  0x7a   :  { %v39_v7 = vperm.slane %v35_v5, %v38_v4 }
  0x7c   :  { %v41_v8 = vmul.f32 %v39_v7, %v30_v6 }
  0x7e   :  { %107 = vst [vmem:[#allocation1] ss:$4 sm:$0xff] %v41_v8 }
  0x85   :  { %v108_v9 = vld.sshfl [vmem:[#allocation1] sm:$0xff pattern:$0x73625140]  ;;  %v109_v10 = vld.sshfl [vmem:[#allocation1 + $0x8] sm:$0xff pattern:$0x73625140] }
  0x86   :  { %128 = vmatmul.f32.vlgmr.msra.gmra.mxu0 %v108_v9  ;;  %148 = vmatmul.f32.vlgmr.msra.gmra.mxu1 %v109_v10 }
  0x87   :  { %168 = vmatmul.f32.vlgmr.msra.gmra.mxu2 %v108_v9  ;;  %188 = vmatmul.f32.vlgmr.msra.gmra.mxu3 %v109_v10 }
 0x103   :  { %v129_v11 = vpop.f32.mrf.mxu0  ;;  %v149_v12 = vpop.f32.mrf.mxu1 }
 0x104   :  { %v150_v16 = vadd.f32 %v149_v12, %v129_v11 }
 0x10a   :  { %v169_v13 = vpop.f32.mrf.mxu2  ;;  %v189_v14 = vpop.f32.mrf.mxu3 }
 0x10b   :  { %v190_v15 = vadd.f32 %v189_v14, %v169_v13 }
 0x10d   :  { %v194_v17 = vrot.slane %v190_v15, 6 }
 0x10f   :  { %v196_v18 = vsel %vm195_vm0, %v150_v16, %v194_v17 }
 0x110   :  { %198 = vst [vmem:[%s276_s3] sm:$0xf] %v196_v18 }
 0x111   :  { %203 = vsyncpa [#allocation3], 1 }

// kernel: jpeg_forward.4
= control target key start
LH: loop header
LB: loop body
LE: loop exit
PB: predicated region body
PF: predicated region fallthrough
CT: control target
= control target key end

     0   :  { %8 = vsyncpa [#allocation3], 0  ;;  %s109_s15 = smov [#allocation2]   ;;  %s110_s17 = smov 128   ;;  %s145_s0 = inlined_call_operand.vmem [shape: f32[2,1], index: 0, kind: input, shape index: {}]   ;;  %s146_s1 = inlined_call_operand.vmem [shape: f32[2,64], index: 1, kind: input, shape index: {}]   ;;  %s147_s2 = inlined_call_operand.hbm [shape: f32[64,64], index: 2, kind: input, shape index: {}]   ;;  %s148_s3 = inlined_call_operand.vmem [shape: f32[2,64], index: 3, kind: output, shape index: {}]  }
   0x1   :  { %s17_s14 = sshll.u32 %s147_s2, 4  ;;  %s19_s16 = sshll.u32 %s109_s15, 4  ;;  %s18_s14 = int_to_ptr.hbm [resolvable:$true] %s17_s14  ;;  %s20_s16 = int_to_ptr.vmem [resolvable:$true] %s19_s16 }
   0x2   :  { %s111_s18 = smov 8  }
   0x3   :  { %25 = dma.hbm_to_vmem [thread:$0]  %s18_s14, 1024, %s20_s16, [#allocation3], %s110_s17, %s110_s17, %s111_s18  }
   0x4   :  { %107 = dma.done.wait [#allocation3], 1024  }
   0x5   :  { %108 = vsyncadd [#allocation3], 4294966272  ;;  %v112_v0 = vmov 0   ;;  %v31_v1 = vld [vmem:[%s145_s0] sm:$0x3]  ;;  %v45_v2 = vld [vmem:[#allocation2 + $0x38] sm:$0xff] }
   0x6   :  { %82 = vset.pattern.permute.xlu0 %v112_v0  ;;  %v44_v3 = vld [vmem:[#allocation2 + $0x30] sm:$0xff]  ;;  %58 = vmatpush.msra.mxu0 %v45_v2  ;;  %v43_v4 = vld [vmem:[#allocation2 + $0x28] sm:$0xff]  ;;  %v42_v5 = vld [vmem:[#allocation2 + $0x20] sm:$0xff]  ;;  %vm46_vm0 = vcmask 523264   ;;  %vm70_vm1 = vcmask 517120  }
   0x7   :  { %34 = vperm.xlu0 %82, %v31_v1   ;;  %v41_v6 = vld [vmem:[#allocation2 + $0x18] sm:$0xff]  ;;  %v40_v7 = vld [vmem:[#allocation2 + $0x10] sm:$0xff]  ;;  %v39_v8 = vld [vmem:[#allocation2 + $0x8] sm:$0xff] }
   0x8   :  { %59 = vmatpush.msra.mxu0 %v44_v3  ;;  %v38_v9 = vld [vmem:[#allocation2] sm:$0xff] }
   0x9   :  { %v30_v10 = vld [vmem:[%s146_s1] sm:$0x3] }
   0xa   :  { %60 = vmatpush.msra.mxu0 %v43_v4 }
   0xc   :  { %61 = vmatpush.msra.mxu0 %v42_v5 }
   0xe   :  { %62 = vmatpush.msra.mxu0 %v41_v6 }
  0x10   :  { %63 = vmatpush.msra.mxu0 %v40_v7 }
  0x12   :  { %64 = vmatpush.msra.mxu0 %v39_v8 }
  0x14   :  { %65 = vmatpush.msra.mxu0 %v38_v9 }
  0x79   :  { %v35_v11 = vpop.permute.xlu0 %34 }
  0x7a   :  { %v37_v12 = vmul.f32 %v35_v11, %v30_v10 }
  0x7c   :  { %77 = vmatmul.msk.f32.vlgmr.msra.gmra.mxu0 %vm46_vm0, %v37_v12 }
  0xf9   :  { %v67_v13 = vpop.f32.mrf.mxu0 }
  0xfa   :  { %71 = vst.msk [vmem:[%s148_s3] sm:$0x3] %vm70_vm1, %v67_v13 }
  0xfb   :  { %76 = vsyncpa [#allocation3], 1 }

</bundles_post_ra>
